<compile_context>
chip_gen: v7x
topology: tpu7x:2x2x1
jax: 0.10.0
libtpu: 0.0.40
codegen_flags: <defaults>
</compile_context>

<pallas_src>
import math
import functools

import jax
import jax.numpy as jnp
from jax.experimental import pallas as pl
from jax.experimental.pallas import tpu as pltpu

EPS = 1e-5
_VMEM_LIMIT = 48 * 1024 * 1024  # conservative: fits v7x (64 MiB) as well as v5e/v6e


def _tile(n, target, align):
    """Largest multiple of `align` that is <= target and divides n; else the full dim."""
    t = (target // align) * align
    while t >= align:
        if n % t == 0:
            return t
        t -= align
    return n


def _cparams(*sem):
    return pltpu.CompilerParams(dimension_semantics=sem, vmem_limit_bytes=_VMEM_LIMIT)


def _ln(x, g):
    """f32 LayerNorm (bias-free) over the last axis."""
    mu = jnp.mean(x, axis=-1, keepdims=True)
    var = jnp.mean(jnp.square(x - mu), axis=-1, keepdims=True)
    return (x - mu) * jax.lax.rsqrt(var + EPS) * g


# ----------------------------- Pallas kernels ------------------------------ #

def _ln_matmul_kernel(x_ref, g_ref, w_ref, o_ref):
    """out = LayerNorm(x) @ W  (LN fused into the projection)."""
    xn = _ln(x_ref[...].astype(jnp.float32), g_ref[...].astype(jnp.float32))
    o_ref[...] = jnp.dot(xn.astype(jnp.bfloat16), w_ref[...],
                         preferred_element_type=jnp.float32).astype(o_ref.dtype)


def _attn_apc_kernel(qkv_ref, qg_ref, kg_ref, ctx_ref, apc_ref, *,
                     n_heads, d_head, scale):
    """qk-LayerNorm + multi-head attention + per-layer APC(symmetrize(crop(p))) partial."""
    d_model = n_heads * d_head
    qkv = qkv_ref[0].astype(jnp.float32)                       # (L, 3D)
    seq = qkv.shape[0]

    q = _ln(qkv[:, :d_model], qg_ref[...].astype(jnp.float32)) * scale  # fold 1/sqrt(dh)
    k = _ln(qkv[:, d_model:2 * d_model], kg_ref[...].astype(jnp.float32))
    v = qkv[:, 2 * d_model:]
    qb = q.astype(jnp.bfloat16)
    kb = k.astype(jnp.bfloat16)
    vb = v.astype(jnp.bfloat16)

    # Interior mask replaces the [1:-1, 1:-1] crop: borders come out exactly zero after
    # APC, interior values match the reference; the crop itself happens on the tiny
    # accumulated map outside the kernel.
    row = jax.lax.broadcasted_iota(jnp.int32, (seq, seq), 0)
    col = jax.lax.broadcasted_iota(jnp.int32, (seq, seq), 1)
    interior = ((row > 0) & (row < seq - 1) &
                (col > 0) & (col < seq - 1)).astype(jnp.float32)

    apc_acc = jnp.zeros((seq, seq), jnp.float32)
    ctx_cols = []
    for h in range(n_heads):
        sl = slice(h * d_head, (h + 1) * d_head)
        qh, kh, vh = qb[:, sl], kb[:, sl], vb[:, sl]

        s = jax.lax.dot_general(qh, kh, (((1,), (1,)), ((), ())),
                                preferred_element_type=jnp.float32)    # (L, L) = q k^T
        p = jnp.exp(s - jnp.max(s, axis=-1, keepdims=True))
        p = p * pl.reciprocal(jnp.sum(p, axis=-1, keepdims=True), approx=True)

        ctx_cols.append(jnp.dot(p.astype(jnp.bfloat16), vh,
                                preferred_element_type=jnp.float32))   # (L, dh)

        # p^T without a transpose op: recompute the transposed scores and normalize
        # along the sublane axis (exactly softmax(s)[j, i]).
        st = jax.lax.dot_general(kh, qh, (((1,), (1,)), ((), ())),
                                 preferred_element_type=jnp.float32)   # st[i,j] = s[j,i]
        pt = jnp.exp(st - jnp.max(st, axis=0, keepdims=True))
        pt = pt * pl.reciprocal(jnp.sum(pt, axis=0, keepdims=True), approx=True)

        y = (p + pt) * interior                 # symmetrize(crop(p)) zero-padded back
        a1 = jnp.sum(y, axis=-1, keepdims=True)
        a2 = jnp.sum(y, axis=-2, keepdims=True)
        a12 = jnp.sum(y, axis=(-1, -2), keepdims=True)
        apc_acc = apc_acc + (y - a1 * a2 / a12)

    ctx_ref[0] = jnp.concatenate(ctx_cols, axis=-1).astype(ctx_ref.dtype)  # lane-dense
    apc_ref[0] = apc_acc


def _proj_residual_kernel(x_ref, a_ref, w_ref, o_ref, *, inv_scale):
    """out = x + (a @ W) / scaling   (output projection fused with residual)."""
    r = jnp.dot(a_ref[...], w_ref[...], preferred_element_type=jnp.float32)
    o_ref[...] = (x_ref[...].astype(jnp.float32) + r * inv_scale).astype(o_ref.dtype)


def _swiglu_residual_kernel(x_ref, g_ref, wg_ref, wu_ref, w2_ref, o_ref, acc_ref, *,
                            inv_scale):
    """out = x + SwiGLU(LayerNorm(x)) / scaling, hidden dim tiled with accumulation."""
    j = pl.program_id(1)

    @pl.when(j == 0)
    def _():
        acc_ref[...] = jnp.zeros_like(acc_ref)

    x = x_ref[...].astype(jnp.float32)
    xn = _ln(x, g_ref[...].astype(jnp.float32)).astype(jnp.bfloat16)
    gate = jnp.dot(xn, wg_ref[...], preferred_element_type=jnp.float32)
    up = jnp.dot(xn, wu_ref[...], preferred_element_type=jnp.float32)
    act = (gate * jax.nn.sigmoid(gate) * up).astype(jnp.bfloat16)      # SiLU(gate)*up
    acc_ref[...] += jnp.dot(act, w2_ref[...], preferred_element_type=jnp.float32)

    @pl.when(j == pl.num_programs(1) - 1)
    def _():
        o_ref[...] = (x + acc_ref[...] * inv_scale).astype(o_ref.dtype)


def _ln_kernel(x_ref, g_ref, o_ref):
    o_ref[...] = _ln(x_ref[...].astype(jnp.float32),
                     g_ref[...].astype(jnp.float32)).astype(o_ref.dtype)


# ----------------------------- kernel wrappers ------------------------------ #

def ln_matmul(x, gamma, w, out_dtype, tm=256, tn=512):
    n, d = x.shape
    f = w.shape[1]
    tm = _tile(n, tm, 8)
    tn = _tile(f, tn, 128)
    return pl.pallas_call(
        _ln_matmul_kernel,
        out_shape=jax.ShapeDtypeStruct((n, f), out_dtype),
        grid=(n // tm, f // tn),
        in_specs=[pl.BlockSpec((tm, d), lambda i, j: (i, 0)),
                  pl.BlockSpec((1, d), lambda i, j: (0, 0)),
                  pl.BlockSpec((d, tn), lambda i, j: (0, j))],
        out_specs=pl.BlockSpec((tm, tn), lambda i, j: (i, j)),
        compiler_params=_cparams("parallel", "parallel"),
    )(x, gamma.reshape(1, d), w)


def attention_apc(qkv3, q_g, k_g, n_heads):
    b, l, d3 = qkv3.shape
    d = d3 // 3
    dh = d // n_heads
    kern = functools.partial(_attn_apc_kernel, n_heads=n_heads, d_head=dh,
                             scale=1.0 / math.sqrt(dh))
    return pl.pallas_call(
        kern,
        out_shape=(jax.ShapeDtypeStruct((b, l, d), jnp.bfloat16),
                   jax.ShapeDtypeStruct((b, l, l), jnp.float32)),
        grid=(b,),
        in_specs=[pl.BlockSpec((1, l, d3), lambda i: (i, 0, 0)),
                  pl.BlockSpec((1, d), lambda i: (0, 0)),
                  pl.BlockSpec((1, d), lambda i: (0, 0))],
        out_specs=(pl.BlockSpec((1, l, d), lambda i: (i, 0, 0)),
                   pl.BlockSpec((1, l, l), lambda i: (i, 0, 0))),
        compiler_params=_cparams("parallel"),
    )(qkv3, q_g.reshape(1, d), k_g.reshape(1, d))


def proj_residual(x, a, w, inv_scale, tm=256, tn=512):
    n, d = a.shape
    f = w.shape[1]
    tm = _tile(n, tm, 8)
    tn = _tile(f, tn, 128)
    kern = functools.partial(_proj_residual_kernel, inv_scale=inv_scale)
    return pl.pallas_call(
        kern,
        out_shape=jax.ShapeDtypeStruct((n, f), jnp.float32),
        grid=(n // tm, f // tn),
        in_specs=[pl.BlockSpec((tm, tn), lambda i, j: (i, j)),
                  pl.BlockSpec((tm, d), lambda i, j: (i, 0)),
                  pl.BlockSpec((d, tn), lambda i, j: (0, j))],
        out_specs=pl.BlockSpec((tm, tn), lambda i, j: (i, j)),
        compiler_params=_cparams("parallel", "parallel"),
    )(x, a, w)


def swiglu_residual(x, gamma, w_gate, w_up, w2, inv_scale, tm=256, th=512):
    n, d = x.shape
    hdim = w_gate.shape[1]
    tm = _tile(n, tm, 8)
    th = _tile(hdim, th, 128)
    kern = functools.partial(_swiglu_residual_kernel, inv_scale=inv_scale)
    return pl.pallas_call(
        kern,
        out_shape=jax.ShapeDtypeStruct((n, d), jnp.float32),
        grid=(n // tm, hdim // th),
        in_specs=[pl.BlockSpec((tm, d), lambda i, j: (i, 0)),
                  pl.BlockSpec((1, d), lambda i, j: (0, 0)),
                  pl.BlockSpec((d, th), lambda i, j: (0, j)),
                  pl.BlockSpec((d, th), lambda i, j: (0, j)),
                  pl.BlockSpec((th, d), lambda i, j: (j, 0))],
        out_specs=pl.BlockSpec((tm, d), lambda i, j: (i, 0)),
        scratch_shapes=[pltpu.VMEM((tm, d), jnp.float32)],
        compiler_params=_cparams("parallel", "arbitrary"),
    )(x, gamma.reshape(1, d), w_gate, w_up, w2)


def layernorm(x, gamma, tm=512):
    n, d = x.shape
    tm = _tile(n, tm, 8)
    return pl.pallas_call(
        _ln_kernel,
        out_shape=jax.ShapeDtypeStruct((n, d), jnp.float32),
        grid=(n // tm,),
        in_specs=[pl.BlockSpec((tm, d), lambda i: (i, 0)),
                  pl.BlockSpec((1, d), lambda i: (0, 0))],
        out_specs=pl.BlockSpec((tm, d), lambda i: (i, 0)),
        compiler_params=_cparams("parallel"),
    )(x, gamma.reshape(1, d))


# ----------------------------- model (glue JAX) ----------------------------- #

def unified_block(x, p, n_heads, inv_scale):
    B, L, D = x.shape
    x2d = x.reshape(B * L, D)

    # fused LN1 + QKV projection (bf16 MXU, tiled & pipelined)
    qkv = ln_matmul(x2d, p["ln1_g"], p["wqkv"], jnp.bfloat16)          # (B*L, 3D)

    # fused qk-LN + multi-head attention + per-layer APC partial (probs never hit HBM)
    ctx, apc_part = attention_apc(qkv.reshape(B, L, 3 * D),
                                  p["q_ln_g"], p["k_ln_g"], n_heads)

    # fused output projection + residual add / scaling
    x2d = proj_residual(x2d, ctx.reshape(B * L, D), p["wo"], inv_scale)

    # fused LN2 + SwiGLU FFN + residual add / scaling (hidden dim K-accumulated)
    x2d = swiglu_residual(x2d, p["ln2_g"], p["w_gate"], p["w_up"], p["w2"], inv_scale)

    return x2d.reshape(B, L, D), apc_part


def transformer_stack(x, params, n_heads):
    B, L, D = x.shape
    n_layers = len(params["blocks"])
    scaling = math.sqrt(n_layers / 36.0)           # scale_residue=True
    inv_scale = 1.0 / scaling

    hiddens = []
    apc_sum = jnp.zeros((B, L, L), jnp.float32)    # streamed APC accumulator
    for blk in params["blocks"]:
        x, apc_part = unified_block(x, blk, n_heads, inv_scale)
        hiddens.append(x)
        apc_sum = apc_sum + apc_part               # (B, layers, H, L, L) never materialized

    hiddens = jnp.stack(hiddens, axis=0)           # (layers, B, L, D)
    # finalize: mean over layers*heads, sigmoid, crop borders (tiny elementwise epilogue)
    attn_map = jax.nn.sigmoid(apc_sum[:, 1:-1, 1:-1] / float(n_layers * n_heads))

    post = layernorm(x.reshape(B * L, D), params["norm_g"]).reshape(B, L, D)
    return post, x, hiddens, attn_map


# ----------------------------- parameter init ------------------------------- #

def init_params(key, d_model, n_layers, expansion_ratio=8.0 / 3.0):
    hidden = ((int(d_model * expansion_ratio) + 7) // 8) * 8
    std = 0.02
    blocks = []
    for i in range(n_layers):
        k = jax.random.fold_in(key, i)
        ks = jax.random.split(k, 5)
        blocks.append(dict(
            ln1_g=jnp.ones((d_model,), jnp.float32),
            wqkv=(std * jax.random.normal(ks[0], (d_model, 3 * d_model),
                                          jnp.float32)).astype(jnp.bfloat16),
            q_ln_g=jnp.ones((d_model,), jnp.float32),
            k_ln_g=jnp.ones((d_model,), jnp.float32),
            wo=(std * jax.random.normal(ks[1], (d_model, d_model),
                                        jnp.float32)).astype(jnp.bfloat16),
            ln2_g=jnp.ones((d_model,), jnp.float32),
            w_gate=(std * jax.random.normal(ks[2], (d_model, hidden),
                                            jnp.float32)).astype(jnp.bfloat16),
            w_up=(std * jax.random.normal(ks[3], (d_model, hidden),
                                          jnp.float32)).astype(jnp.bfloat16),
            w2=(std * jax.random.normal(ks[4], (hidden, d_model),
                                        jnp.float32)).astype(jnp.bfloat16),
        ))
    return dict(blocks=blocks, norm_g=jnp.ones((d_model,), jnp.float32))


# ----------------------------------- main ----------------------------------- #

if __name__ == "__main__":
    B, L, D, H, N_LAYERS = 2, 8, 32, 4, 2
    key = jax.random.PRNGKey(0)
    params = init_params(key, D, N_LAYERS)
    x = jax.random.normal(jax.random.fold_in(key, 999), (B, L, D), dtype=jnp.float32)

    post, pre, hiddens, attn_maps = transformer_stack(x, params, H)
    jax.block_until_ready((post, pre, hiddens, attn_maps))

    assert post.shape == (B, L, D)
    assert pre.shape == (B, L, D)
    assert hiddens.shape == (N_LAYERS, B, L, D)
    assert attn_maps.shape == (B, L - 2, L - 2)
    assert bool(jnp.all(jnp.isfinite(post))) and bool(jnp.all(jnp.isfinite(attn_maps)))
    print("KERNEL_OK")
</pallas_src>

<mosaic_0001>
module attributes {stable_mosaic.version = 11 : i64} {
  func.func @_ln_matmul_kernel(%arg0: i32, %arg1: i32, %arg2: memref<16x32xf32, #tpu.memory_space<vmem>>, %arg3: memref<1x32xf32, #tpu.memory_space<vmem>>, %arg4: memref<32x96xbf16, #tpu.memory_space<vmem>>, %arg5: memref<16x96xbf16, #tpu.memory_space<vmem>>) attributes {dimension_semantics = [#tpu.dimension_semantics<parallel>, #tpu.dimension_semantics<parallel>], iteration_bounds = array<i64: 1, 1>, scalar_prefetch = 0 : i64, scratch_operands = 0 : i64, tpu.core_type = #tpu.core_type<tc>, window_params = [{transform_indices = @transform_0, window_bounds = array<i64: 16, 32>}, {pipeline_mode = #tpu.pipeline_mode<synchronous>, transform_indices = @transform_1, window_bounds = array<i64: 1, 32>}, {transform_indices = @transform_2, window_bounds = array<i64: 32, 96>}, {transform_indices = @transform_3, window_bounds = array<i64: 16, 96>}]} {
    %c0 = arith.constant 0 : index
    %c0_0 = arith.constant 0 : index
    %0 = vector.load %arg2[%c0, %c0_0] : memref<16x32xf32, #tpu.memory_space<vmem>>, vector<16x32xf32>
    %c0_1 = arith.constant 0 : index
    %c0_2 = arith.constant 0 : index
    %1 = vector.load %arg3[%c0_1, %c0_2] : memref<1x32xf32, #tpu.memory_space<vmem>>, vector<1x32xf32>
    %cst = arith.constant dense<0.000000e+00> : vector<16xf32>
    %2 = vector.multi_reduction <add>, %0, %cst [1] : vector<16x32xf32> to vector<16xf32>
    %3 = vector.shape_cast %2 : vector<16xf32> to vector<16x1xf32>
    %cst_3 = arith.constant 3.200000e+01 : f32
    %4 = vector.broadcast %cst_3 : f32 to vector<16x1xf32>
    %5 = arith.divf %3, %4 : vector<16x1xf32>
    %6 = vector.broadcast %5 : vector<16x1xf32> to vector<16x32xf32>
    %7 = arith.subf %0, %6 : vector<16x32xf32>
    %8 = arith.mulf %7, %7 : vector<16x32xf32>
    %cst_4 = arith.constant dense<0.000000e+00> : vector<16xf32>
    %9 = vector.multi_reduction <add>, %8, %cst_4 [1] : vector<16x32xf32> to vector<16xf32>
    %10 = vector.shape_cast %9 : vector<16xf32> to vector<16x1xf32>
    %cst_5 = arith.constant 3.200000e+01 : f32
    %11 = vector.broadcast %cst_5 : f32 to vector<16x1xf32>
    %12 = arith.divf %10, %11 : vector<16x1xf32>
    %13 = vector.broadcast %5 : vector<16x1xf32> to vector<16x32xf32>
    %14 = arith.subf %0, %13 : vector<16x32xf32>
    %cst_6 = arith.constant 9.99999974E-6 : f32
    %15 = vector.broadcast %cst_6 : f32 to vector<16x1xf32>
    %16 = arith.addf %12, %15 : vector<16x1xf32>
    %17 = math.rsqrt %16 : vector<16x1xf32>
    %18 = vector.broadcast %17 : vector<16x1xf32> to vector<16x32xf32>
    %19 = arith.mulf %14, %18 : vector<16x32xf32>
    %20 = vector.broadcast %1 : vector<1x32xf32> to vector<16x32xf32>
    %21 = arith.mulf %19, %20 : vector<16x32xf32>
    %22 = arith.truncf %21 : vector<16x32xf32> to vector<16x32xbf16>
    %c0_7 = arith.constant 0 : index
    %c0_8 = arith.constant 0 : index
    %23 = vector.load %arg4[%c0_7, %c0_8] : memref<32x96xbf16, #tpu.memory_space<vmem>>, vector<32x96xbf16>
    %cst_9 = arith.constant dense<0.000000e+00> : vector<16x96xf32>
    %24 = tpu.matmul %22, %23, %cst_9 {dimension_numbers = #tpu.dot_dimension_numbers<[1], [0], [0], [1], [0, 0, 1, 1], [], []>} : vector<16x32xbf16>, vector<32x96xbf16>, vector<16x96xf32> -> vector<16x96xf32>
    %25 = arith.truncf %24 : vector<16x96xf32> to vector<16x96xbf16>
    %c0_10 = arith.constant 0 : index
    %c0_11 = arith.constant 0 : index
    %26 = vector.load %arg5[%c0_10, %c0_11] : memref<16x96xbf16, #tpu.memory_space<vmem>>, vector<16x96xbf16>
    tpu.vector_store %arg5[%c0_10, %c0_11], %25 {strides = array<i32>} : memref<16x96xbf16, #tpu.memory_space<vmem>>, vector<16x96xbf16>,
    return
  }
  func.func @transform_0(%arg0: i32, %arg1: i32) -> (i32, i32) {
    %c0_i32 = arith.constant 0 : i32
    %c0_i32_0 = arith.constant 0 : i32
    return %arg0, %c0_i32 : i32, i32
  }
  func.func @transform_1(%arg0: i32, %arg1: i32) -> (i32, i32) {
    %c0_i32 = arith.constant 0 : i32
    %c0_i32_0 = arith.constant 0 : i32
    %c0_i32_1 = arith.constant 0 : i32
    return %c0_i32, %c0_i32_0 : i32, i32
  }
  func.func @transform_2(%arg0: i32, %arg1: i32) -> (i32, i32) {
    %c0_i32 = arith.constant 0 : i32
    %c0_i32_0 = arith.constant 0 : i32
    return %c0_i32, %arg1 : i32, i32
  }
  func.func @transform_3(%arg0: i32, %arg1: i32) -> (i32, i32) {
    %c0_i32 = arith.constant 0 : i32
    return %arg0, %arg1 : i32, i32
  }
}

</mosaic_0001>

<bundles_post_ra>
// kernel: tpu_custom_call.1
= control target key start
LH: loop header
LB: loop body
LE: loop exit
PB: predicated region body
PF: predicated region fallthrough
CT: control target
= control target key end

     0   :  { %8 = vsyncpa [#allocation3], 0  ;;  %s358_s0 = inlined_call_operand.hbm [shape: f32[16,32], index: 0, kind: input, shape index: {}]   ;;  %s359_s1 = inlined_call_operand.vmem [shape: f32[1,32], index: 1, kind: input, shape index: {}]   ;;  %s360_s2 = inlined_call_operand.hbm [shape: bf16[32,96], index: 2, kind: input, shape index: {}]   ;;  %s361_s3 = inlined_call_operand.hbm [shape: bf16[16,96], index: 3, kind: output, shape index: {}]  }
   0x1   :  { %9 = vsyncpa [#allocation6], 0 }
   0x2   :  { %10 = vsyncpa [#allocation4], 0  ;;  %s279_s12 = smov [#allocation2]   ;;  %s207_s16 = scalar_lea.hbm %s358_s0, 256 }
   0x3   :  { %s16_s13 = sshll.u32 %s279_s12, 4  ;;  %p208_p0 = scmp.ne.s32.totalorder %s358_s0, %s207_s16  ;;  %s17_s13 = int_to_ptr.vmem [resolvable:$true] %s16_s13 }
   0x4   :  { %p211_p1 = scmp.lt.u32.totalorder %s207_s16, %s358_s0 }
   0x6   :  { %p213_p2 = pnand %p211_p1, %p208_p0 }
   0x8   :  { %216 = shalt.err (!%p213_p2)
}
   0x9   :  { %s217_s21 = scalar_lea.vmem %s17_s13, 256  ;;  %p222_p4 = scmp.lt.s32.totalorder %s17_s13, %s17_s13 }
   0xa   :  { %p218_p3 = scmp.ne.s32.totalorder %s17_s13, %s217_s21  ;;  %p223_p5 = scmp.lt.s32.totalorder %s217_s21, %s217_s21 }
   0xc   :  { %p224_p6 = por %p223_p5, %p222_p4 }
   0xe   :  { %p225_p7 = pnand %p224_p6, %p218_p3 }
  0x10   :  { %228 = shalt.err (!%p225_p7)
}
  0x11   :  { %s280_s22 = smov 128   ;;  %s281_s23 = smov 8  }
  0x12   :  { %22 = dma.hbm_to_vmem [thread:$0]  %s358_s0, 256, %s17_s13, [#allocation3], %s280_s22, %s280_s22, %s281_s23  }
  0x13   :  { %s282_s26 = smov [#allocation5]   ;;  %s229_s30 = scalar_lea.hbm %s360_s2, 256 }
  0x14   :  { %s30_s27 = sshll.u32 %s282_s26, 4  ;;  %p230_p8 = scmp.ne.s32.totalorder %s360_s2, %s229_s30  ;;  %s31_s27 = int_to_ptr.vmem [resolvable:$true] %s30_s27 }
  0x15   :  { %p233_p9 = scmp.lt.u32.totalorder %s229_s30, %s360_s2 }
  0x17   :  { %p235_p10 = pnand %p233_p9, %p230_p8 }
  0x19   :  { %238 = shalt.err (!%p235_p10)
}
  0x1a   :  { %s239_s8 = scalar_lea.vmem %s31_s27, 256  ;;  %p244_p12 = scmp.lt.s32.totalorder %s31_s27, %s31_s27 }
  0x1b   :  { %p240_p11 = scmp.ne.s32.totalorder %s31_s27, %s239_s8  ;;  %p245_p13 = scmp.lt.s32.totalorder %s239_s8, %s239_s8 }
  0x1d   :  { %p246_p0 = por %p245_p13, %p244_p12 }
  0x1f   :  { %p247_p1 = pnand %p246_p0, %p240_p11 }
  0x21   :  { %250 = shalt.err (!%p247_p1)
}
  0x22   :  { %s283_s0 = smov 64   ;;  %s284_s9 = smov 4  }
  0x23   :  { %36 = dma.hbm_to_vmem [thread:$0]  %s360_s2, 256, %s31_s27, [#allocation6], %s283_s0, %s283_s0, %s284_s9  }
  0x24   :  { %273 = dma.done.wait [#allocation3], 256  }
  0x25   :  { %274 = vsyncadd [#allocation3], 4294967040 }
  0x26   :  { %275 = dma.done.wait [#allocation6], 256  }
  0x27   :  { %276 = vsyncadd [#allocation6], 4294967040  ;;  %vm47_vm0 = vcmask 261120   ;;  %v44_v0 = vld [vmem:[#allocation2] sm:$0xff]  ;;  %v45_v1 = vld [vmem:[#allocation2 + $0x8] sm:$0xff]  ;;  %v285_v15 = vmov 0.0  }
  0x28   :  { %v48_v2 = vsel %vm47_vm0, %v44_v0, 0.0  ;;  %v51_v3 = vsel %vm47_vm0, %v45_v1, 0.0  ;;  %v201_v14 = vld [vmem:[#allocation5] sm:$0xff]   ;;  %184 = vmatprep.subr.bf16.mxu0 %v285_v15  ;;  %vm286_vm1 = vmmov 0   ;;  %v202_v16 = vld [vmem:[#allocation5 + $0x8] sm:$0xff]   ;;  %vm152_vm2 = vcmask 781312  }
  0x29   :  { %49 = vadd.xlane.f32.xlu0 %v48_v2  ;;  %188 = vmatprep.mubr.msk.bf16.mxu0 %vm286_vm1, %v285_v15  ;;  %v173_v26 = vld [vmem:[%s359_s1] ss:$0 sm:$0xff]  ;;  %s287_s13 = smov [#allocation7]  }
  0x2a   :  { %185 = vmatpush3.bf16.msra.mxu0 %v201_v14  ;;  %s160_s14 = sshll.u32 %s287_s13, 4  ;;  %s161_s14 = int_to_ptr.vmem [resolvable:$true] %s160_s14 }
  0x2b   :  { %186 = vmatprep.subr.bf16.mxu0 %v285_v15  ;;  %s251_s15 = scalar_lea.vmem %s161_s14, 128  ;;  %p256_p3 = scmp.lt.s32.totalorder %s161_s14, %s161_s14 }
  0x2c   :  { %p252_p2 = scmp.ne.s32.totalorder %s161_s14, %s251_s15  ;;  %p257_p4 = scmp.lt.s32.totalorder %s251_s15, %s251_s15 }
  0x2d   :  { %52 = vadd.xlane.f32.xlu0 %v51_v3 }
  0x2e   :  { %187 = vmatpush3.bf16.msra.mxu0 %v202_v16  ;;  %p258_p5 = por %p257_p4, %p256_p3 }
  0x30   :  { %p259_p6 = pnand %p258_p5, %p252_p2 }
  0xb6   :  { %v50_v4 = vpop.xlane.xlu0 %49 }
  0xb7   :  { %v55_v5 = vmul.f32 0.03125, %v50_v4 }
  0xb9   :  { %v57_v6 = vsub.f32 %v44_v0, %v55_v5 }
  0xba   :  { %v53_v7 = vpop.xlane.xlu0 %52 }
  0xbb   :  { %v56_v8 = vmul.f32 0.03125, %v53_v7  ;;  %v59_v9 = vmul.f32 %v57_v6, %v57_v6 }
  0xbd   :  { %v58_v10 = vsub.f32 %v45_v1, %v56_v8  ;;  %v61_v11 = vsel %vm47_vm0, %v59_v9, 0.0 }
  0xbe   :  { %62 = vadd.xlane.f32.xlu1 %v61_v11 }
  0xbf   :  { %v60_v12 = vmul.f32 %v58_v10, %v58_v10 }
  0xc1   :  { %v64_v13 = vsel %vm47_vm0, %v60_v12, 0.0 }
  0xc2   :  { %65 = vadd.xlane.f32.xlu1 %v64_v13 }
 0x14b   :  { %v63_v17 = vpop.xlane.xlu1 %62 }
 0x14c   :  { %v67_v18 = vmul.f32 0.03125, %v63_v17 }
 0x14e   :  { %v69_v19 = vadd.f32 1e-05, %v67_v18 }
 0x14f   :  { %v66_v20 = vpop.xlane.xlu1 %65 }
 0x150   :  { %203 = vrsqrt.f32 %v69_v19  ;;  %v68_v21 = vmul.f32 0.03125, %v66_v20 }
 0x152   :  { %v70_v22 = vadd.f32 1e-05, %v68_v21 }
 0x154   :  { %205 = vrsqrt.f32 %v70_v22 }
 0x15a   :  { %v204_v23 = vpop.eup %203 }
 0x15b   :  { %v73_v24 = vmul.f32 %v204_v23, %v57_v6 }
 0x15d   :  { %v81_v28 = vmul.f32 %v173_v26, %v73_v24 }
 0x15e   :  { %v206_v25 = vpop.eup %205 }
 0x15f   :  { %v74_v27 = vmul.f32 %v206_v25, %v58_v10 }
 0x161   :  { %v82_v29 = vmul.f32 %v173_v26, %v74_v27 }
 0x163   :  { %v83_v30 = vpack.c.bf16 %v82_v29, %v81_v28 }
 0x165   :  { %189 = vmatmul.mubr.msk.bf16.vlgmr.msra.gmra.mrb[0].mxu0 %vm47_vm0, %v83_v30 }
 0x238   :  { %v137_v31 = vpop.f32.mrb[0].mxu0 }
 0x239   :  { %v179_v32 = vpack.c.bf16 %v137_v31, %v137_v31  ;;  %v190_v33 = vpop.f32.mrb[1].mxu0 }
 0x23a   :  { %v140_v34 = vpop.f32.mrb[2].mxu0 }
 0x23b   :  { %v180_v35 = vpack.c.bf16 %v140_v34, %v140_v34  ;;  %v191_v36 = vpop.f32.mrb[3].mxu0  ;;  %153 = vst.msk [vmem:[#allocation7] sm:$0xf] %vm152_vm2, %v179_v32 }
 0x23d   :  { %154 = vst.msk [vmem:[#allocation7 + $0x4] sm:$0xf] %vm152_vm2, %v180_v35 }
 0x23e   :  { %262 = shalt.err (!%p259_p6)
}
 0x23f   :  { %s263_s17 = scalar_lea.hbm %s361_s3, 128 }
 0x240   :  { %p264_p7 = scmp.ne.s32.totalorder %s361_s3, %s263_s17  ;;  %p267_p8 = scmp.lt.u32.totalorder %s263_s17, %s361_s3 }
 0x242   :  { %p269_p9 = pnand %p267_p8, %p264_p7 }
 0x244   :  { %272 = shalt.err (!%p269_p9)
}
 0x245   :  { %166 = dma.vmem_to_hbm [thread:$0]  %s161_s14, 128, %s361_s3, [#allocation4], %s283_s0, %s283_s0, %s284_s9  }
 0x246   :  { %277 = dma.done.wait [#allocation4], 128  }
 0x247   :  { %278 = vsyncadd [#allocation4], 4294967168 }
 0x248   :  { %170 = vsyncpa [#allocation3], 1 }
 0x249   :  { %171 = vsyncpa [#allocation6], 1 }
 0x24a   :  { %172 = vsyncpa [#allocation4], 1 }

</bundles_post_ra>
